<compile_context>
chip_gen: v6e
topology: v6e:2x2x1
jax: 0.10.0
libtpu: 0.0.40
codegen_flags: <defaults>
</compile_context>

<pallas_src>
import functools

import jax
import jax.numpy as jnp
from jax.experimental import pallas as pl
from jax.experimental.pallas import tpu as pltpu


def _pick_tile(dim, candidates):
    for c in candidates:
        if dim % c == 0:
            return c
    return dim  # fall back to the full dimension (always a legal block)


# ----------------------------------------------------------------------------
# Tiled linear kernel:  out = x @ W + b
#   x: (M, K)   W: (K, N)  -- already transposed in the wrapper   b: (1, N)
# ----------------------------------------------------------------------------
def _linear_kernel(x_ref, w_ref, b_ref, o_ref, acc_ref):
    k = pl.program_id(2)

    @pl.when(k == 0)
    def _():
        acc_ref[...] = jnp.zeros_like(acc_ref)

    # MXU operands stay in the input dtype (bf16 stays bf16); accumulate in f32.
    acc_ref[...] += jnp.dot(
        x_ref[...], w_ref[...], preferred_element_type=jnp.float32
    )

    @pl.when(k == pl.num_programs(2) - 1)
    def _():
        o_ref[...] = (acc_ref[...] + b_ref[...].astype(jnp.float32)).astype(o_ref.dtype)


def pallas_linear(x2d, w_t, b_row):
    """x2d: (M, K); w_t: (K, N) pre-transposed weight; b_row: (1, N)."""
    m, kdim = x2d.shape
    n = w_t.shape[1]
    tm = _pick_tile(m, (512, 256, 128))
    tn = _pick_tile(n, (256, 128))
    tk = _pick_tile(kdim, (512, 256, 128))
    grid = (m // tm, n // tn, kdim // tk)
    return pl.pallas_call(
        _linear_kernel,
        grid=grid,
        out_shape=jax.ShapeDtypeStruct((m, n), x2d.dtype),
        in_specs=[
            pl.BlockSpec((tm, tk), lambda i, j, k: (i, k)),
            pl.BlockSpec((tk, tn), lambda i, j, k: (k, j)),
            pl.BlockSpec((1, tn), lambda i, j, k: (0, j)),
        ],
        out_specs=pl.BlockSpec((tm, tn), lambda i, j, k: (i, j)),
        scratch_shapes=[pltpu.VMEM((tm, tn), jnp.float32)],
        compiler_params=pltpu.CompilerParams(
            dimension_semantics=("parallel", "parallel", "arbitrary")
        ),
    )(x2d, w_t, b_row)


# ----------------------------------------------------------------------------
# Attention kernel: one grid step = one batch element, ALL heads at once.
#   q: (1, T, E)  k,v: (1, S, E)  ->  attn: (1, T, E)  weights: (1, T, S)
# ----------------------------------------------------------------------------
def _attention_kernel(q_ref, k_ref, v_ref, o_ref, w_ref, *, num_heads):
    tgt_len = q_ref.shape[1]
    embed_dim = q_ref.shape[2]
    src_len = k_ref.shape[1]
    head_dim = embed_dim // num_heads

    qb = q_ref[0]  # (T, E) input dtype (bf16 stays bf16 on the MXU)
    kb = k_ref[0]  # (S, E)
    vb = v_ref[0]  # (S, E)

    w_acc = jnp.zeros((tgt_len, src_len), jnp.float32)
    attn_parts = []
    for h in range(num_heads):  # static unroll: all heads in one grid step
        lo = h * head_dim
        qh = qb[:, lo:lo + head_dim]  # (T, Hd)
        kh = kb[:, lo:lo + head_dim]  # (S, Hd)
        vh = vb[:, lo:lo + head_dim]  # (S, Hd)

        # Contract the last dims of q and k directly -> no in-kernel transpose.
        s = jax.lax.dot_general(
            qh, kh, (((1,), (1,)), ((), ())), preferred_element_type=jnp.float32
        )  # (T, S) f32
        s = s - jnp.max(s, axis=-1, keepdims=True)
        p = jnp.exp(s)
        p = p * pl.reciprocal(jnp.sum(p, axis=-1, keepdims=True), approx=True)

        w_acc = w_acc + p
        attn_parts.append(
            jnp.dot(p.astype(vh.dtype), vh, preferred_element_type=jnp.float32)
        )  # (T, Hd) f32

    # Single lane-dense (T, E) store (last dim = num_heads * head_dim).
    o_ref[0] = jnp.concatenate(attn_parts, axis=-1).astype(o_ref.dtype)
    # Head-averaged weights computed in-kernel: the (B*H, T, S) probability
    # tensor is never materialized in HBM.
    w_ref[0] = (w_acc * (1.0 / num_heads)).astype(w_ref.dtype)


# ----------------------------------------------------------------------------
# Full forward pass.
# ----------------------------------------------------------------------------
def multihead_attention_forward(query, key, value, params, num_heads):
    tgt_len, bsz, embed_dim = query.shape
    src_len = key.shape[0]
    head_dim = embed_dim // num_heads
    scaling = head_dim ** (-0.5)
    dtype = query.dtype

    # Pre-transpose weights once to (in, out) and fold the query scaling into Wq
    # so the kernels never transpose weights or rescale q.
    wq_t = (params["wq_w"] * scaling).T.astype(dtype)
    wq_b = (params["wq_b"] * scaling).reshape(1, -1).astype(dtype)
    wk_t = params["wk_w"].T.astype(dtype)
    wk_b = params["wk_b"].reshape(1, -1).astype(dtype)
    wv_t = params["wv_w"].T.astype(dtype)
    wv_b = params["wv_b"].reshape(1, -1).astype(dtype)
    wo_t = params["out_w"].T.astype(dtype)
    wo_b = params["out_b"].reshape(1, -1).astype(dtype)

    # Single layout pass: Time-major -> batch-major. Everything downstream
    # (projections, attention, out-projection) stays batch-major, so no further
    # activation transposes happen until the final output.
    q_bt = query.transpose(1, 0, 2).reshape(bsz * tgt_len, -1)
    k_bt = key.transpose(1, 0, 2).reshape(bsz * src_len, -1)
    v_bt = value.transpose(1, 0, 2).reshape(bsz * src_len, -1)

    q = pallas_linear(q_bt, wq_t, wq_b).reshape(bsz, tgt_len, embed_dim)
    k = pallas_linear(k_bt, wk_t, wk_b).reshape(bsz, src_len, embed_dim)
    v = pallas_linear(v_bt, wv_t, wv_b).reshape(bsz, src_len, embed_dim)

    attn, attn_weights = pl.pallas_call(
        functools.partial(_attention_kernel, num_heads=num_heads),
        grid=(bsz,),
        out_shape=(
            jax.ShapeDtypeStruct((bsz, tgt_len, embed_dim), dtype),
            jax.ShapeDtypeStruct((bsz, tgt_len, src_len), dtype),
        ),
        in_specs=[
            pl.BlockSpec((1, tgt_len, embed_dim), lambda b: (b, 0, 0)),
            pl.BlockSpec((1, src_len, embed_dim), lambda b: (b, 0, 0)),
            pl.BlockSpec((1, src_len, embed_dim), lambda b: (b, 0, 0)),
        ],
        out_specs=(
            pl.BlockSpec((1, tgt_len, embed_dim), lambda b: (b, 0, 0)),
            pl.BlockSpec((1, tgt_len, src_len), lambda b: (b, 0, 0)),
        ),
        compiler_params=pltpu.CompilerParams(dimension_semantics=("parallel",)),
    )(q, k, v)

    # Out-projection consumes batch-major rows directly (no transpose here).
    out_bt = pallas_linear(attn.reshape(bsz * tgt_len, embed_dim), wo_t, wo_b)
    out = out_bt.reshape(bsz, tgt_len, embed_dim).transpose(1, 0, 2)  # -> (T, B, E)
    return out, attn_weights


# ----------------------------------------------------------------------------
# Pure-JAX reference (mirrors the PyTorch module) for a sanity check.
# ----------------------------------------------------------------------------
def _reference(query, key, value, params, num_heads):
    tgt_len, bsz, embed_dim = query.shape
    src_len = key.shape[0]
    head_dim = embed_dim // num_heads
    scaling = head_dim ** (-0.5)

    def lin(x, w, b):
        return x @ w.T + b

    q = lin(query, params["wq_w"], params["wq_b"]) * scaling
    k = lin(key, params["wk_w"], params["wk_b"])
    v = lin(value, params["wv_w"], params["wv_b"])
    bh = bsz * num_heads
    qh = q.reshape(tgt_len, bh, head_dim).transpose(1, 0, 2)
    kh = k.reshape(src_len, bh, head_dim).transpose(1, 0, 2)
    vh = v.reshape(src_len, bh, head_dim).transpose(1, 0, 2)
    s = jnp.einsum("btd,bsd->bts", qh, kh)
    p = jax.nn.softmax(s, axis=-1)
    a = jnp.einsum("bts,bsd->btd", p, vh)
    a = a.transpose(1, 0, 2).reshape(tgt_len, bsz, embed_dim)
    out = lin(a, params["out_w"], params["out_b"])
    w = p.reshape(bsz, num_heads, tgt_len, src_len).sum(axis=1) / num_heads
    return out, w


if __name__ == "__main__":
    embed_dim, num_heads = 32, 4
    tgt_len = src_len = 8
    bsz = 2

    key0 = jax.random.PRNGKey(0)
    keys = jax.random.split(key0, 12)
    scale = 0.1
    params = {
        "wq_w": scale * jax.random.normal(keys[0], (embed_dim, embed_dim), jnp.float32),
        "wq_b": scale * jax.random.normal(keys[1], (embed_dim,), jnp.float32),
        "wk_w": scale * jax.random.normal(keys[2], (embed_dim, embed_dim), jnp.float32),
        "wk_b": scale * jax.random.normal(keys[3], (embed_dim,), jnp.float32),
        "wv_w": scale * jax.random.normal(keys[4], (embed_dim, embed_dim), jnp.float32),
        "wv_b": scale * jax.random.normal(keys[5], (embed_dim,), jnp.float32),
        "out_w": scale * jax.random.normal(keys[6], (embed_dim, embed_dim), jnp.float32),
        "out_b": scale * jax.random.normal(keys[7], (embed_dim,), jnp.float32),
    }

    query = jax.random.normal(keys[8], (tgt_len, bsz, embed_dim), jnp.float32)
    key_in = jax.random.normal(keys[9], (src_len, bsz, embed_dim), jnp.float32)
    value = jax.random.normal(keys[10], (src_len, bsz, embed_dim), jnp.float32)

    attn, attn_weights = multihead_attention_forward(
        query, key_in, value, params, num_heads
    )
    attn = jax.block_until_ready(attn)
    attn_weights = jax.block_until_ready(attn_weights)

    ref_attn, ref_w = _reference(query, key_in, value, params, num_heads)
    assert attn.shape == (tgt_len, bsz, embed_dim)
    assert attn_weights.shape == (bsz, tgt_len, src_len)
    # Tolerance accounts for the EUP approximate reciprocal in the softmax.
    assert jnp.allclose(attn, ref_attn, atol=2e-3, rtol=2e-3)
    assert jnp.allclose(attn_weights, ref_w, atol=2e-3, rtol=2e-3)

    print("KERNEL_OK")
</pallas_src>

<mosaic_0001>
module attributes {stable_mosaic.version = 11 : i64} {
  func.func @_linear_kernel(%arg0: i32, %arg1: i32, %arg2: i32, %arg3: memref<16x32xf32, #tpu.memory_space<vmem>>, %arg4: memref<32x32xf32, #tpu.memory_space<vmem>>, %arg5: memref<1x32xf32, #tpu.memory_space<vmem>>, %arg6: memref<16x32xf32, #tpu.memory_space<vmem>>, %arg7: memref<16x32xf32, #tpu.memory_space<vmem>>) attributes {dimension_semantics = [#tpu.dimension_semantics<parallel>, #tpu.dimension_semantics<parallel>, #tpu.dimension_semantics<arbitrary>], iteration_bounds = array<i64: 1, 1, 1>, scalar_prefetch = 0 : i64, scratch_operands = 1 : i64, tpu.core_type = #tpu.core_type<tc>, window_params = [{transform_indices = @transform_0, window_bounds = array<i64: 16, 32>}, {transform_indices = @transform_1, window_bounds = array<i64: 32, 32>}, {transform_indices = @transform_2, window_bounds = array<i64: 1, 32>}, {transform_indices = @transform_3, window_bounds = array<i64: 16, 32>}]} {
    %c0_i32 = arith.constant 0 : i32
    %0 = arith.cmpi eq, %arg2, %c0_i32 : i32
    %1 = arith.extui %0 : i1 to i32
    %c0_i32_0 = arith.constant 0 : i32
    %2 = arith.cmpi ne, %1, %c0_i32_0 : i32
    scf.if %2 {
      %cst_10 = arith.constant 0.000000e+00 : f32
      %12 = vector.broadcast %cst_10 : f32 to vector<16x32xf32>
      %c0_11 = arith.constant 0 : index
      %c0_12 = arith.constant 0 : index
      %13 = vector.load %arg7[%c0_11, %c0_12] : memref<16x32xf32, #tpu.memory_space<vmem>>, vector<16x32xf32>
      tpu.vector_store %arg7[%c0_11, %c0_12], %12 {strides = array<i32>} : memref<16x32xf32, #tpu.memory_space<vmem>>, vector<16x32xf32>,
    } else {
    }
    %c0 = arith.constant 0 : index
    %c0_1 = arith.constant 0 : index
    %3 = vector.load %arg7[%c0, %c0_1] : memref<16x32xf32, #tpu.memory_space<vmem>>, vector<16x32xf32>
    %c0_2 = arith.constant 0 : index
    %c0_3 = arith.constant 0 : index
    %4 = vector.load %arg3[%c0_2, %c0_3] : memref<16x32xf32, #tpu.memory_space<vmem>>, vector<16x32xf32>
    %c0_4 = arith.constant 0 : index
    %c0_5 = arith.constant 0 : index
    %5 = vector.load %arg4[%c0_4, %c0_5] : memref<32x32xf32, #tpu.memory_space<vmem>>, vector<32x32xf32>
    %cst = arith.constant dense<0.000000e+00> : vector<16x32xf32>
    %6 = tpu.matmul %4, %5, %cst {dimension_numbers = #tpu.dot_dimension_numbers<[1], [0], [0], [1], [0, 0, 1, 1], [], []>} : vector<16x32xf32>, vector<32x32xf32>, vector<16x32xf32> -> vector<16x32xf32>
    %7 = arith.addf %3, %6 : vector<16x32xf32>
    %c0_6 = arith.constant 0 : index
    %c0_7 = arith.constant 0 : index
    %8 = vector.load %arg7[%c0_6, %c0_7] : memref<16x32xf32, #tpu.memory_space<vmem>>, vector<16x32xf32>
    tpu.vector_store %arg7[%c0_6, %c0_7], %7 {strides = array<i32>} : memref<16x32xf32, #tpu.memory_space<vmem>>, vector<16x32xf32>,
    %c0_i32_8 = arith.constant 0 : i32
    %9 = arith.cmpi eq, %arg2, %c0_i32_8 : i32
    %10 = arith.extui %9 : i1 to i32
    %c0_i32_9 = arith.constant 0 : i32
    %11 = arith.cmpi ne, %10, %c0_i32_9 : i32
    scf.if %11 {
      %c0_10 = arith.constant 0 : index
      %c0_11 = arith.constant 0 : index
      %12 = vector.load %arg7[%c0_10, %c0_11] : memref<16x32xf32, #tpu.memory_space<vmem>>, vector<16x32xf32>
      %c0_12 = arith.constant 0 : index
      %c0_13 = arith.constant 0 : index
      %13 = vector.load %arg5[%c0_12, %c0_13] : memref<1x32xf32, #tpu.memory_space<vmem>>, vector<1x32xf32>
      %14 = vector.broadcast %13 : vector<1x32xf32> to vector<16x32xf32>
      %15 = arith.addf %12, %14 : vector<16x32xf32>
      %c0_14 = arith.constant 0 : index
      %c0_15 = arith.constant 0 : index
      %16 = vector.load %arg6[%c0_14, %c0_15] : memref<16x32xf32, #tpu.memory_space<vmem>>, vector<16x32xf32>
      tpu.vector_store %arg6[%c0_14, %c0_15], %15 {strides = array<i32>} : memref<16x32xf32, #tpu.memory_space<vmem>>, vector<16x32xf32>,
    } else {
    }
    return
  }
  func.func @transform_0(%arg0: i32, %arg1: i32, %arg2: i32) -> (i32, i32) {
    %c0_i32 = arith.constant 0 : i32
    return %arg0, %arg2 : i32, i32
  }
  func.func @transform_1(%arg0: i32, %arg1: i32, %arg2: i32) -> (i32, i32) {
    %c0_i32 = arith.constant 0 : i32
    return %arg2, %arg1 : i32, i32
  }
  func.func @transform_2(%arg0: i32, %arg1: i32, %arg2: i32) -> (i32, i32) {
    %c0_i32 = arith.constant 0 : i32
    %c0_i32_0 = arith.constant 0 : i32
    return %c0_i32, %arg1 : i32, i32
  }
  func.func @transform_3(%arg0: i32, %arg1: i32, %arg2: i32) -> (i32, i32) {
    %c0_i32 = arith.constant 0 : i32
    return %arg0, %arg1 : i32, i32
  }
}

</mosaic_0001>

<bundles_post_ra>
// kernel: tpu_custom_call.1
= control target key start
LH: loop header
LB: loop body
LE: loop exit
PB: predicated region body
PF: predicated region fallthrough
CT: control target
= control target key end

     0   :  { %8 = vsyncpa [#allocation4], 0  ;;  %s325_s0 = inlined_call_operand.hbm [shape: f32[16,32], index: 0, kind: input, shape index: {}]   ;;  %s326_s1 = inlined_call_operand.hbm [shape: f32[32,32], index: 1, kind: input, shape index: {}]   ;;  %s327_s2 = inlined_call_operand.vmem [shape: f32[1,32], index: 2, kind: input, shape index: {}]   ;;  %s328_s3 = inlined_call_operand.hbm [shape: f32[16,32], index: 3, kind: output, shape index: {}]  }
   0x1   :  { %9 = vsyncpa [#allocation7], 0 }
   0x2   :  { %10 = vsyncpa [#allocation5], 0  ;;  %s270_s12 = smov [#allocation3]  }
   0x3   :  { %s16_s13 = sshll.u32 %s270_s12, 4  ;;  %s17_s13 = int_to_ptr.vmem [resolvable:$true] %s16_s13 }
   0x4   :  { %s212_s14 = scalar_lea.vmem %s17_s13, 256  ;;  %p217_p1 = scmp.lt.s32.totalorder %s17_s13, %s17_s13 }
   0x5   :  { %p213_p0 = scmp.ne.s32.totalorder %s17_s13, %s212_s14  ;;  %p218_p2 = scmp.lt.s32.totalorder %s212_s14, %s212_s14 }
   0x7   :  { %p219_p3 = por %p218_p2, %p217_p1 }
   0x9   :  { %p220_p4 = pnand %p219_p3, %p213_p0 }
   0xb   :  { %223 = shalt.err (!%p220_p4)
}
   0xc   :  { %s271_s15 = smov 128   ;;  %s272_s16 = smov 8  }
   0xd   :  { %22 = dma.hbm_to_vmem [thread:$0]  %s325_s0, 256, %s17_s13, [#allocation4], %s271_s15, %s271_s15, %s272_s16  }
   0xe   :  { %s273_s19 = smov [#allocation6]  }
   0xf   :  { %s28_s20 = sshll.u32 %s273_s19, 4  ;;  %s29_s20 = int_to_ptr.vmem [resolvable:$true] %s28_s20 }
  0x10   :  { %s232_s21 = scalar_lea.vmem %s29_s20, 512  ;;  %p237_p6 = scmp.lt.s32.totalorder %s29_s20, %s29_s20 }
  0x11   :  { %p233_p5 = scmp.ne.s32.totalorder %s29_s20, %s232_s21  ;;  %p238_p7 = scmp.lt.s32.totalorder %s232_s21, %s232_s21 }
  0x13   :  { %p239_p8 = por %p238_p7, %p237_p6 }
  0x15   :  { %p240_p9 = pnand %p239_p8, %p233_p5 }
  0x17   :  { %243 = shalt.err (!%p240_p9)
}
  0x18   :  { %34 = dma.hbm_to_vmem [thread:$0]  %s326_s1, 512, %s29_s20, [#allocation7], %s271_s15, %s271_s15, %s272_s16  }
  0x19   :  { %264 = dma.done.wait [#allocation4], 256  }
  0x1a   :  { %265 = vsyncadd [#allocation4], 4294967040 }
  0x1b   :  { %266 = dma.done.wait [#allocation7], 512  }
  0x1c   :  { %267 = vsyncadd [#allocation7], 4294966784  ;;  %vm47_vm0 = vcmask 261120   ;;  %v274_v0 = vmov 0.0   ;;  %v57_v1 = vld [vmem:[#allocation6 + $0x18] sm:$0xff]  ;;  %v56_v2 = vld [vmem:[#allocation6 + $0x10] sm:$0xff] }
  0x1d   :  { %49 = vst.msk [vmem:[#allocation2 + $0x8] sm:$0xff] %vm47_vm0, %v274_v0  ;;  %48 = vst.msk [vmem:[#allocation2] sm:$0xff] %vm47_vm0, %v274_v0  ;;  %187 = vmatprep.subr.mxu0 %v57_v1  ;;  %v52_v3 = vld [vmem:[#allocation3] sm:$0xff]  ;;  %v55_v4 = vld [vmem:[#allocation6 + $0x8] sm:$0xff]  ;;  %s275_s24 = smov [#allocation8]  }
  0x1e   :  { %188 = vmatpush3.msra.mxu0 %v57_v1  ;;  %195 = vmatprep.mubr.msk.f32.mxu0 %vm47_vm0, %v52_v3  ;;  %v54_v5 = vld [vmem:[#allocation6] sm:$0xff]  ;;  %v53_v6 = vld [vmem:[#allocation3 + $0x8] sm:$0xff]  ;;  %s165_s25 = sshll.u32 %s275_s24, 4  ;;  %s166_s25 = int_to_ptr.vmem [resolvable:$true] %s165_s25 }
  0x1f   :  { %189 = vmatprep.subr.mxu0 %v56_v2  ;;  %v180_v13 = vld [vmem:[%s327_s2] ss:$0 sm:$0xff]  ;;  %s244_s26 = scalar_lea.vmem %s166_s25, 256  ;;  %p249_p11 = scmp.lt.s32.totalorder %s166_s25, %s166_s25 }
  0x20   :  { %190 = vmatpush3.msra.mxu0 %v56_v2  ;;  %p245_p10 = scmp.ne.s32.totalorder %s166_s25, %s244_s26  ;;  %p250_p12 = scmp.lt.s32.totalorder %s244_s26, %s244_s26 }
  0x21   :  { %191 = vmatprep.subr.mxu0 %v55_v4 }
  0x22   :  { %192 = vmatpush3.msra.mxu0 %v55_v4  ;;  %p251_p13 = por %p250_p12, %p249_p11 }
  0x23   :  { %193 = vmatprep.subr.mxu0 %v54_v5 }
  0x24   :  { %194 = vmatpush3.msra.mxu0 %v54_v5  ;;  %v51_v7 = vld [vmem:[#allocation2 + $0x8] sm:$0xff]  ;;  %v50_v9 = vld [vmem:[#allocation2] sm:$0xff]  ;;  %p252_p0 = pnand %p251_p13, %p245_p10 }
  0x25   :  { %196 = vmatmul.mubr.msk.f32.vlgmr.msra.gmra.mxu0 %vm47_vm0, %v53_v6 }
  0xe5   :  { %v197_v8 = vpop.f32.mrf.mxu0 }
  0xe6   :  { %v141_v10 = vadd.f32 %v197_v8, %v51_v7 }
  0xe7   :  { %v131_v11 = vpop.f32.mrf.mxu0 }
  0xe8   :  { %143 = vst.msk [vmem:[#allocation2 + $0x8] sm:$0xff] %vm47_vm0, %v141_v10  ;;  %v140_v12 = vadd.f32 %v131_v11, %v50_v9 }
  0xea   :  { %142 = vst.msk [vmem:[#allocation2] sm:$0xff] %vm47_vm0, %v140_v12 }
  0xef   :  { %v148_v14 = vld [vmem:[#allocation2 + $0x8] sm:$0xff] }
  0xf0   :  { %v157_v15 = vadd.f32 %v180_v13, %v148_v14 }
  0xf1   :  { %v147_v16 = vld [vmem:[#allocation2] sm:$0xff] }
  0xf2   :  { %v156_v17 = vadd.f32 %v180_v13, %v147_v16  ;;  %159 = vst.msk [vmem:[#allocation8 + $0x8] sm:$0xff] %vm47_vm0, %v157_v15 }
  0xf4   :  { %158 = vst.msk [vmem:[#allocation8] sm:$0xff] %vm47_vm0, %v156_v17 }
  0xf5   :  { %255 = shalt.err (!%p252_p0)
}
  0xf6   :  { %171 = dma.vmem_to_hbm [thread:$0]  %s166_s25, 256, %s328_s3, [#allocation5], %s271_s15, %s271_s15, %s272_s16  }
  0xf7   :  { %268 = dma.done.wait [#allocation5], 256  }
  0xf8   :  { %269 = vsyncadd [#allocation5], 4294967040 }
  0xf9   :  { %175 = vsyncpa [#allocation4], 1 }
  0xfa   :  { %176 = vsyncpa [#allocation7], 1 }
  0xfb   :  { %177 = vsyncpa [#allocation5], 1 }

</bundles_post_ra>
